<compile_context>
chip_gen: v6e
topology: v6e:2x2x1
jax: 0.10.0
libtpu: 0.0.40
codegen_flags: <defaults>
</compile_context>

<pallas_src>
import functools

import jax
import jax.numpy as jnp
from jax.experimental import pallas as pl
from jax.experimental.pallas import tpu as pltpu


def _painn_kernel(F, N, TP,
                  q_ref, mu_ref, w1_ref, b1_ref, w2_ref, b2_ref,
                  fab_ref, idxi_ref, idxj_ref,
                  out_ref, slab_ref):
    # ------- once, at the first pair tile: per-atom MLP + gather slab + acc init -------
    @pl.when(pl.program_id(0) == 0)
    def _init():
        q = q_ref[...]                                   # (N, F)
        mu_cat = mu_ref[...]                             # (N, 3F) = [mu_x | mu_y | mu_z]

        h = jnp.dot(q, w1_ref[...], preferred_element_type=jnp.float32) + b1_ref[...]
        h = h * jax.nn.sigmoid(h)                        # SiLU
        x = jnp.dot(h, w2_ref[...], preferred_element_type=jnp.float32) + b2_ref[...]  # (N, 3F)

        xa = x[:, 0 * F:1 * F]                           # dq channel
        xb = x[:, 1 * F:2 * F]                           # dmuR channel
        xc = x[:, 2 * F:3 * F]                           # dmumu channel

        # gather slab (N, 8F): [xa | xb | xb | xb | dummy | xc*mu_x | xc*mu_y | xc*mu_z]
        slab_ref[:, 0 * F:1 * F] = xa
        slab_ref[:, 1 * F:2 * F] = xb
        slab_ref[:, 2 * F:3 * F] = xb
        slab_ref[:, 3 * F:4 * F] = xb
        slab_ref[:, 4 * F:5 * F] = xa                    # dummy block (filter is zero there)
        slab_ref[:, 5 * F:6 * F] = xc * mu_cat[:, 0 * F:1 * F]
        slab_ref[:, 6 * F:7 * F] = xc * mu_cat[:, 1 * F:2 * F]
        slab_ref[:, 7 * F:8 * F] = xc * mu_cat[:, 2 * F:3 * F]

        # residual init of the resident (N, 4F) accumulator: [q | mu_x | mu_y | mu_z]
        out_ref[:, :F] = q
        out_ref[:, F:] = mu_cat

    # -------------------------------- per pair tile -------------------------------------
    fab = fab_ref[...]                                   # (TP, 8F) host-prefolded filter
    idx_j = idxj_ref[...]                                # (TP, 1) int32
    idx_i = idxi_ref[...]                                # (1, TP) int32

    # gather one-hot (TP, N): row p selects atom idx_j[p]; sentinel idx == N -> zero row
    col = jax.lax.broadcasted_iota(jnp.int32, (TP, N), 1)
    gj = (idx_j == col).astype(jnp.float32)
    gathered = jnp.dot(gj, slab_ref[...], preferred_element_type=jnp.float32)   # (TP, 8F)

    prod = fab * gathered                                # (TP, 8F)
    d_wide = prod[:, :4 * F] + prod[:, 4 * F:]           # (TP, 4F) = [dq | dmu_x | dmu_y | dmu_z]

    # scatter-add one-hot built pre-oriented as (N, TP) -> canonical matmul, no transpose
    row = jax.lax.broadcasted_iota(jnp.int32, (N, TP), 0)
    sit = (row == idx_i).astype(jnp.float32)             # (N, TP)
    out_ref[...] += jnp.dot(sit, d_wide, preferred_element_type=jnp.float32)


def painn_interaction(q, mu, Wij, dir_ij, idx_i, idx_j, n_atoms, params, *, pair_tile=128):
    """q: (N,1,F), mu: (N,3,F), Wij: (P,1,3F), dir_ij: (P,3), idx_*: (P,) int."""
    N, _, F = q.shape
    P = idx_i.shape[0]
    assert n_atoms == N
    W1, b1, W2, b2 = params                              # (F,F), (1,F), (F,3F), (1,3F)

    TP = pair_tile
    P_pad = int(pl.cdiv(P, TP)) * TP
    pad = P_pad - P
    num_tiles = P_pad // TP

    q2 = q.reshape(N, F).astype(jnp.float32)
    mu_cat = mu.reshape(N, 3 * F).astype(jnp.float32)    # [mu_x | mu_y | mu_z]
    wij2 = Wij.reshape(P, 3 * F).astype(jnp.float32)
    dvec = dir_ij.astype(jnp.float32)

    wa = wij2[:, :F]
    wb = wij2[:, F:2 * F]
    wc = wij2[:, 2 * F:]
    # host-folded per-pair filter (P, 8F): [Wa | Wb*dx | Wb*dy | Wb*dz | 0 | Wc | Wc | Wc]
    fab = jnp.concatenate(
        [wa,
         wb * dvec[:, 0:1], wb * dvec[:, 1:2], wb * dvec[:, 2:3],
         jnp.zeros_like(wa), wc, wc, wc], axis=-1)
    fab = jnp.pad(fab, ((0, pad), (0, 0)))
    # sentinel index N for padded pairs -> matches no atom -> zero gather & scatter rows
    idx_i_p = jnp.pad(idx_i.astype(jnp.int32), (0, pad), constant_values=N).reshape(1, P_pad)
    idx_j_p = jnp.pad(idx_j.astype(jnp.int32), (0, pad), constant_values=N).reshape(P_pad, 1)

    kernel = functools.partial(_painn_kernel, F, N, TP)

    out = pl.pallas_call(
        kernel,
        out_shape=jax.ShapeDtypeStruct((N, 4 * F), jnp.float32),
        grid=(num_tiles,),
        in_specs=[
            pl.BlockSpec((N, F), lambda i: (0, 0)),        # q
            pl.BlockSpec((N, 3 * F), lambda i: (0, 0)),    # mu_cat
            pl.BlockSpec((F, F), lambda i: (0, 0)),        # W1
            pl.BlockSpec((1, F), lambda i: (0, 0)),        # b1
            pl.BlockSpec((F, 3 * F), lambda i: (0, 0)),    # W2
            pl.BlockSpec((1, 3 * F), lambda i: (0, 0)),    # b2
            pl.BlockSpec((TP, 8 * F), lambda i: (i, 0)),   # prefolded filter (streamed)
            pl.BlockSpec((1, TP), lambda i: (0, i)),       # idx_i (scatter), streamed
            pl.BlockSpec((TP, 1), lambda i: (i, 0)),       # idx_j (gather), streamed
        ],
        out_specs=pl.BlockSpec((N, 4 * F), lambda i: (0, 0)),   # resident accumulator
        scratch_shapes=[pltpu.VMEM((N, 8 * F), jnp.float32)],   # gather slab
        compiler_params=pltpu.CompilerParams(
            dimension_semantics=("arbitrary",),
            vmem_limit_bytes=64 * 1024 * 1024,
        ),
    )(q2, mu_cat,
      W1.astype(jnp.float32), b1.astype(jnp.float32),
      W2.astype(jnp.float32), b2.astype(jnp.float32),
      fab, idx_i_p, idx_j_p)

    q_out = out[:, :F].reshape(N, 1, F)
    mu_out = out[:, F:].reshape(N, 3, F)
    return q_out, mu_out


def reference(q, mu, Wij, dir_ij, idx_i, idx_j, n_atoms, params):
    """Pure-JAX reference matching the PyTorch forward exactly."""
    W1, b1, W2, b2 = params
    F = q.shape[-1]
    h = q @ W1 + b1.reshape(F)
    h = h * jax.nn.sigmoid(h)
    x = h @ W2 + b2.reshape(3 * F)
    xj = x[idx_j]
    muj = mu[idx_j]
    x = Wij * xj
    dq, dmuR, dmumu = jnp.split(x, 3, axis=-1)
    dq = jnp.zeros((n_atoms, 1, F), jnp.float32).at[idx_i].add(dq)
    dmu = dmuR * dir_ij[..., None] + dmumu * muj
    dmu = jnp.zeros((n_atoms, 3, F), jnp.float32).at[idx_i].add(dmu)
    return q + dq, mu + dmu


if __name__ == "__main__":
    key = jax.random.PRNGKey(0)
    N = 16         # n_atoms
    F = 32         # n_atom_basis
    P = 300        # number of pairs (pads to 3 tiles of 128 -> exercises the grid)

    ks = jax.random.split(key, 10)
    q = jax.random.normal(ks[0], (N, 1, F), jnp.float32)
    mu = jax.random.normal(ks[1], (N, 3, F), jnp.float32)
    Wij = jax.random.normal(ks[2], (P, 1, 3 * F), jnp.float32)
    dir_raw = jax.random.normal(ks[3], (P, 3), jnp.float32)
    dir_ij = dir_raw / jnp.linalg.norm(dir_raw, axis=-1, keepdims=True)
    idx_i = jax.random.randint(ks[4], (P,), 0, N, jnp.int32)
    idx_j = jax.random.randint(ks[5], (P,), 0, N, jnp.int32)

    # Deterministic params (Dense(F->F, SiLU), Dense(F->3F)); weights stored as (in, out).
    W1 = jax.random.normal(ks[6], (F, F), jnp.float32) / jnp.sqrt(F)
    b1 = jax.random.normal(ks[7], (1, F), jnp.float32) * 0.01
    W2 = jax.random.normal(ks[8], (F, 3 * F), jnp.float32) / jnp.sqrt(F)
    b2 = jax.random.normal(ks[9], (1, 3 * F), jnp.float32) * 0.01
    params = (W1, b1, W2, b2)

    q_out, mu_out = painn_interaction(q, mu, Wij, dir_ij, idx_i, idx_j, N, params)
    jax.block_until_ready((q_out, mu_out))

    q_ref, mu_ref = reference(q, mu, Wij, dir_ij, idx_i, idx_j, N, params)
    err_q = float(jnp.max(jnp.abs(q_out - q_ref)))
    err_mu = float(jnp.max(jnp.abs(mu_out - mu_ref)))
    assert jnp.allclose(q_out, q_ref, rtol=1e-4, atol=1e-4), err_q
    assert jnp.allclose(mu_out, mu_ref, rtol=1e-4, atol=1e-4), err_mu
    print("KERNEL_OK")
</pallas_src>

<mosaic_0001>
module attributes {stable_mosaic.version = 11 : i64} {
  func.func @_painn_kernel(%arg0: i32, %arg1: memref<16x32xf32, #tpu.memory_space<vmem>>, %arg2: memref<16x96xf32, #tpu.memory_space<vmem>>, %arg3: memref<32x32xf32, #tpu.memory_space<vmem>>, %arg4: memref<1x32xf32, #tpu.memory_space<vmem>>, %arg5: memref<32x96xf32, #tpu.memory_space<vmem>>, %arg6: memref<1x96xf32, #tpu.memory_space<vmem>>, %arg7: memref<128x256xf32, #tpu.memory_space<vmem>>, %arg8: memref<1x128xi32, #tpu.memory_space<vmem>>, %arg9: memref<128x1xi32, #tpu.memory_space<vmem>>, %arg10: memref<16x128xf32, #tpu.memory_space<vmem>>, %arg11: memref<16x256xf32, #tpu.memory_space<vmem>>) attributes {dimension_semantics = [#tpu.dimension_semantics<arbitrary>], iteration_bounds = array<i64: 3>, scalar_prefetch = 0 : i64, scratch_operands = 1 : i64, tpu.core_type = #tpu.core_type<tc>, window_params = [{pipeline_mode = #tpu.pipeline_mode<synchronous>, transform_indices = @transform_0, window_bounds = array<i64: 16, 32>}, {pipeline_mode = #tpu.pipeline_mode<synchronous>, transform_indices = @transform_1, window_bounds = array<i64: 16, 96>}, {pipeline_mode = #tpu.pipeline_mode<synchronous>, transform_indices = @transform_2, window_bounds = array<i64: 32, 32>}, {pipeline_mode = #tpu.pipeline_mode<synchronous>, transform_indices = @transform_3, window_bounds = array<i64: 1, 32>}, {pipeline_mode = #tpu.pipeline_mode<synchronous>, transform_indices = @transform_4, window_bounds = array<i64: 32, 96>}, {pipeline_mode = #tpu.pipeline_mode<synchronous>, transform_indices = @transform_5, window_bounds = array<i64: 1, 96>}, {transform_indices = @transform_6, window_bounds = array<i64: 128, 256>}, {transform_indices = @transform_7, window_bounds = array<i64: 1, 128>}, {transform_indices = @transform_8, window_bounds = array<i64: 128, 1>}, {pipeline_mode = #tpu.pipeline_mode<synchronous>, transform_indices = @transform_9, window_bounds = array<i64: 16, 128>}]} {
    %c0_i32 = arith.constant 0 : i32
    %0 = arith.cmpi eq, %arg0, %c0_i32 : i32
    %1 = arith.extui %0 : i1 to i32
    %c0_i32_0 = arith.constant 0 : i32
    %2 = arith.cmpi ne, %1, %c0_i32_0 : i32
    scf.if %2 {
      %c0_13 = arith.constant 0 : index
      %c0_14 = arith.constant 0 : index
      %26 = vector.load %arg1[%c0_13, %c0_14] : memref<16x32xf32, #tpu.memory_space<vmem>>, vector<16x32xf32>
      %c0_15 = arith.constant 0 : index
      %c0_16 = arith.constant 0 : index
      %27 = vector.load %arg2[%c0_15, %c0_16] : memref<16x96xf32, #tpu.memory_space<vmem>>, vector<16x96xf32>
      %c0_17 = arith.constant 0 : index
      %c0_18 = arith.constant 0 : index
      %28 = vector.load %arg3[%c0_17, %c0_18] : memref<32x32xf32, #tpu.memory_space<vmem>>, vector<32x32xf32>
      %cst_19 = arith.constant dense<0.000000e+00> : vector<16x32xf32>
      %29 = tpu.matmul %26, %28, %cst_19 {dimension_numbers = #tpu.dot_dimension_numbers<[1], [0], [0], [1], [0, 0, 1, 1], [], []>} : vector<16x32xf32>, vector<32x32xf32>, vector<16x32xf32> -> vector<16x32xf32>
      %c0_20 = arith.constant 0 : index
      %c0_21 = arith.constant 0 : index
      %30 = vector.load %arg4[%c0_20, %c0_21] : memref<1x32xf32, #tpu.memory_space<vmem>>, vector<1x32xf32>
      %31 = vector.broadcast %30 : vector<1x32xf32> to vector<16x32xf32>
      %32 = arith.addf %29, %31 : vector<16x32xf32>
      %33 = arith.negf %32 : vector<16x32xf32>
      %34 = math.exp %33 : vector<16x32xf32>
      %cst_22 = arith.constant 1.000000e+00 : f32
      %35 = vector.broadcast %cst_22 : f32 to vector<16x32xf32>
      %36 = arith.addf %35, %34 : vector<16x32xf32>
      %37 = arith.divf %35, %36 : vector<16x32xf32>
      %38 = arith.mulf %32, %37 : vector<16x32xf32>
      %c0_23 = arith.constant 0 : index
      %c0_24 = arith.constant 0 : index
      %39 = vector.load %arg5[%c0_23, %c0_24] : memref<32x96xf32, #tpu.memory_space<vmem>>, vector<32x96xf32>
      %cst_25 = arith.constant dense<0.000000e+00> : vector<16x96xf32>
      %40 = tpu.matmul %38, %39, %cst_25 {dimension_numbers = #tpu.dot_dimension_numbers<[1], [0], [0], [1], [0, 0, 1, 1], [], []>} : vector<16x32xf32>, vector<32x96xf32>, vector<16x96xf32> -> vector<16x96xf32>
      %c0_26 = arith.constant 0 : index
      %c0_27 = arith.constant 0 : index
      %41 = vector.load %arg6[%c0_26, %c0_27] : memref<1x96xf32, #tpu.memory_space<vmem>>, vector<1x96xf32>
      %42 = vector.broadcast %41 : vector<1x96xf32> to vector<16x96xf32>
      %43 = arith.addf %40, %42 : vector<16x96xf32>
      %44 = vector.extract_strided_slice %43 {offsets = [0, 0], sizes = [16, 32], strides = [1, 1]} : vector<16x96xf32> to vector<16x32xf32>
      %45 = vector.extract_strided_slice %43 {offsets = [0, 32], sizes = [16, 32], strides = [1, 1]} : vector<16x96xf32> to vector<16x32xf32>
      %46 = vector.extract_strided_slice %43 {offsets = [0, 64], sizes = [16, 32], strides = [1, 1]} : vector<16x96xf32> to vector<16x32xf32>
      %c0_28 = arith.constant 0 : index
      %c0_29 = arith.constant 0 : index
      %47 = vector.load %arg11[%c0_28, %c0_29] : memref<16x256xf32, #tpu.memory_space<vmem>>, vector<16x32xf32>
      tpu.vector_store %arg11[%c0_28, %c0_29], %44 {strides = array<i32>} : memref<16x256xf32, #tpu.memory_space<vmem>>, vector<16x32xf32>,
      %c0_30 = arith.constant 0 : index
      %c32 = arith.constant 32 : index
      %48 = vector.load %arg11[%c0_30, %c32] : memref<16x256xf32, #tpu.memory_space<vmem>>, vector<16x32xf32>
      tpu.vector_store %arg11[%c0_30, %c32], %45 {strides = array<i32>} : memref<16x256xf32, #tpu.memory_space<vmem>>, vector<16x32xf32>,
      %c0_31 = arith.constant 0 : index
      %c64 = arith.constant 64 : index
      %49 = vector.load %arg11[%c0_31, %c64] : memref<16x256xf32, #tpu.memory_space<vmem>>, vector<16x32xf32>
      tpu.vector_store %arg11[%c0_31, %c64], %45 {strides = array<i32>} : memref<16x256xf32, #tpu.memory_space<vmem>>, vector<16x32xf32>,
      %c0_32 = arith.constant 0 : index
      %c96 = arith.constant 96 : index
      %50 = vector.load %arg11[%c0_32, %c96] : memref<16x256xf32, #tpu.memory_space<vmem>>, vector<16x32xf32>
      tpu.vector_store %arg11[%c0_32, %c96], %45 {strides = array<i32>} : memref<16x256xf32, #tpu.memory_space<vmem>>, vector<16x32xf32>,
      %c0_33 = arith.constant 0 : index
      %c128 = arith.constant 128 : index
      %51 = vector.load %arg11[%c0_33, %c128] : memref<16x256xf32, #tpu.memory_space<vmem>>, vector<16x32xf32>
      tpu.vector_store %arg11[%c0_33, %c128], %44 {strides = array<i32>} : memref<16x256xf32, #tpu.memory_space<vmem>>, vector<16x32xf32>,
      %52 = vector.extract_strided_slice %27 {offsets = [0, 0], sizes = [16, 32], strides = [1, 1]} : vector<16x96xf32> to vector<16x32xf32>
      %53 = arith.mulf %46, %52 : vector<16x32xf32>
      %c0_34 = arith.constant 0 : index
      %c160 = arith.constant 160 : index
      %54 = vector.load %arg11[%c0_34, %c160] : memref<16x256xf32, #tpu.memory_space<vmem>>, vector<16x32xf32>
      tpu.vector_store %arg11[%c0_34, %c160], %53 {strides = array<i32>} : memref<16x256xf32, #tpu.memory_space<vmem>>, vector<16x32xf32>,
      %55 = vector.extract_strided_slice %27 {offsets = [0, 32], sizes = [16, 32], strides = [1, 1]} : vector<16x96xf32> to vector<16x32xf32>
      %56 = arith.mulf %46, %55 : vector<16x32xf32>
      %c0_35 = arith.constant 0 : index
      %c192 = arith.constant 192 : index
      %57 = vector.load %arg11[%c0_35, %c192] : memref<16x256xf32, #tpu.memory_space<vmem>>, vector<16x32xf32>
      tpu.vector_store %arg11[%c0_35, %c192], %56 {strides = array<i32>} : memref<16x256xf32, #tpu.memory_space<vmem>>, vector<16x32xf32>,
      %58 = vector.extract_strided_slice %27 {offsets = [0, 64], sizes = [16, 32], strides = [1, 1]} : vector<16x96xf32> to vector<16x32xf32>
      %59 = arith.mulf %46, %58 : vector<16x32xf32>
      %c0_36 = arith.constant 0 : index
      %c224 = arith.constant 224 : index
      %60 = vector.load %arg11[%c0_36, %c224] : memref<16x256xf32, #tpu.memory_space<vmem>>, vector<16x32xf32>
      tpu.vector_store %arg11[%c0_36, %c224], %59 {strides = array<i32>} : memref<16x256xf32, #tpu.memory_space<vmem>>, vector<16x32xf32>,
      %c0_37 = arith.constant 0 : index
      %c0_38 = arith.constant 0 : index
      %61 = vector.load %arg10[%c0_37, %c0_38] : memref<16x128xf32, #tpu.memory_space<vmem>>, vector<16x32xf32>
      tpu.vector_store %arg10[%c0_37, %c0_38], %26 {strides = array<i32>} : memref<16x128xf32, #tpu.memory_space<vmem>>, vector<16x32xf32>,
      %c0_39 = arith.constant 0 : index
      %c32_40 = arith.constant 32 : index
      %62 = vector.load %arg10[%c0_39, %c32_40] : memref<16x128xf32, #tpu.memory_space<vmem>>, vector<16x96xf32>
      tpu.vector_store %arg10[%c0_39, %c32_40], %27 {strides = array<i32>} : memref<16x128xf32, #tpu.memory_space<vmem>>, vector<16x96xf32>,
    } else {
    }
    %c0 = arith.constant 0 : index
    %c0_1 = arith.constant 0 : index
    %3 = vector.load %arg7[%c0, %c0_1] : memref<128x256xf32, #tpu.memory_space<vmem>>, vector<128x256xf32>
    %c0_2 = arith.constant 0 : index
    %c0_3 = arith.constant 0 : index
    %4 = vector.load %arg9[%c0_2, %c0_3] : memref<128x1xi32, #tpu.memory_space<vmem>>, vector<128x1xi32>
    %c0_4 = arith.constant 0 : index
    %c0_5 = arith.constant 0 : index
    %5 = vector.load %arg8[%c0_4, %c0_5] : memref<1x128xi32, #tpu.memory_space<vmem>>, vector<1x128xi32>
    %6 = tpu.iota {dimensions = array<i32: 1>} : vector<128x16xi32>
    %7 = vector.broadcast %4 : vector<128x1xi32> to vector<128x16xi32>
    %8 = arith.cmpi eq, %7, %6 : vector<128x16xi32>
    %9 = arith.extui %8 : vector<128x16xi1> to vector<128x16xi32>
    %10 = arith.sitofp %9 : vector<128x16xi32> to vector<128x16xf32>
    %c0_6 = arith.constant 0 : index
    %c0_7 = arith.constant 0 : index
    %11 = vector.load %arg11[%c0_6, %c0_7] : memref<16x256xf32, #tpu.memory_space<vmem>>, vector<16x256xf32>
    %cst = arith.constant dense<0.000000e+00> : vector<128x256xf32>
    %12 = tpu.matmul %10, %11, %cst {dimension_numbers = #tpu.dot_dimension_numbers<[1], [0], [0], [1], [0, 0, 1, 1], [], []>} : vector<128x16xf32>, vector<16x256xf32>, vector<128x256xf32> -> vector<128x256xf32>
    %13 = arith.mulf %3, %12 : vector<128x256xf32>
    %14 = vector.extract_strided_slice %13 {offsets = [0, 0], sizes = [128, 128], strides = [1, 1]} : vector<128x256xf32> to vector<128x128xf32>
    %15 = vector.extract_strided_slice %13 {offsets = [0, 128], sizes = [128, 128], strides = [1, 1]} : vector<128x256xf32> to vector<128x128xf32>
    %16 = arith.addf %14, %15 : vector<128x128xf32>
    %17 = tpu.iota {dimensions = array<i32: 0>} : vector<16x128xi32>
    %18 = vector.broadcast %5 : vector<1x128xi32> to vector<16x128xi32>
    %19 = arith.cmpi eq, %17, %18 : vector<16x128xi32>
    %20 = arith.extui %19 : vector<16x128xi1> to vector<16x128xi32>
    %21 = arith.sitofp %20 : vector<16x128xi32> to vector<16x128xf32>
    %c0_8 = arith.constant 0 : index
    %c0_9 = arith.constant 0 : index
    %22 = vector.load %arg10[%c0_8, %c0_9] : memref<16x128xf32, #tpu.memory_space<vmem>>, vector<16x128xf32>
    %cst_10 = arith.constant dense<0.000000e+00> : vector<16x128xf32>
    %23 = tpu.matmul %21, %16, %cst_10 {dimension_numbers = #tpu.dot_dimension_numbers<[1], [0], [0], [1], [0, 0, 1, 1], [], []>} : vector<16x128xf32>, vector<128x128xf32>, vector<16x128xf32> -> vector<16x128xf32>
    %24 = arith.addf %22, %23 : vector<16x128xf32>
    %c0_11 = arith.constant 0 : index
    %c0_12 = arith.constant 0 : index
    %25 = vector.load %arg10[%c0_11, %c0_12] : memref<16x128xf32, #tpu.memory_space<vmem>>, vector<16x128xf32>
    tpu.vector_store %arg10[%c0_11, %c0_12], %24 {strides = array<i32>} : memref<16x128xf32, #tpu.memory_space<vmem>>, vector<16x128xf32>,
    return
  }
  func.func @transform_0(%arg0: i32) -> (i32, i32) {
    %c0_i32 = arith.constant 0 : i32
    %c0_i32_0 = arith.constant 0 : i32
    %c0_i32_1 = arith.constant 0 : i32
    return %c0_i32, %c0_i32_0 : i32, i32
  }
  func.func @transform_1(%arg0: i32) -> (i32, i32) {
    %c0_i32 = arith.constant 0 : i32
    %c0_i32_0 = arith.constant 0 : i32
    %c0_i32_1 = arith.constant 0 : i32
    return %c0_i32, %c0_i32_0 : i32, i32
  }
  func.func @transform_2(%arg0: i32) -> (i32, i32) {
    %c0_i32 = arith.constant 0 : i32
    %c0_i32_0 = arith.constant 0 : i32
    %c0_i32_1 = arith.constant 0 : i32
    return %c0_i32, %c0_i32_0 : i32, i32
  }
  func.func @transform_3(%arg0: i32) -> (i32, i32) {
    %c0_i32 = arith.constant 0 : i32
    %c0_i32_0 = arith.constant 0 : i32
    %c0_i32_1 = arith.constant 0 : i32
    return %c0_i32, %c0_i32_0 : i32, i32
  }
  func.func @transform_4(%arg0: i32) -> (i32, i32) {
    %c0_i32 = arith.constant 0 : i32
    %c0_i32_0 = arith.constant 0 : i32
    %c0_i32_1 = arith.constant 0 : i32
    return %c0_i32, %c0_i32_0 : i32, i32
  }
  func.func @transform_5(%arg0: i32) -> (i32, i32) {
    %c0_i32 = arith.constant 0 : i32
    %c0_i32_0 = arith.constant 0 : i32
    %c0_i32_1 = arith.constant 0 : i32
    return %c0_i32, %c0_i32_0 : i32, i32
  }
  func.func @transform_6(%arg0: i32) -> (i32, i32) {
    %c0_i32 = arith.constant 0 : i32
    %c0_i32_0 = arith.constant 0 : i32
    return %arg0, %c0_i32 : i32, i32
  }
  func.func @transform_7(%arg0: i32) -> (i32, i32) {
    %c0_i32 = arith.constant 0 : i32
    %c0_i32_0 = arith.constant 0 : i32
    return %c0_i32, %arg0 : i32, i32
  }
  func.func @transform_8(%arg0: i32) -> (i32, i32) {
    %c0_i32 = arith.constant 0 : i32
    %c0_i32_0 = arith.constant 0 : i32
    return %arg0, %c0_i32 : i32, i32
  }
  func.func @transform_9(%arg0: i32) -> (i32, i32) {
    %c0_i32 = arith.constant 0 : i32
    %c0_i32_0 = arith.constant 0 : i32
    %c0_i32_1 = arith.constant 0 : i32
    return %c0_i32, %c0_i32_0 : i32, i32
  }
}

</mosaic_0001>

<bundles_post_ra>
// kernel: tpu_custom_call.1
= control target key start
LH: loop header
LB: loop body
LE: loop exit
PB: predicated region body
PF: predicated region fallthrough
CT: control target
= control target key end

     0   :  { %14 = vsyncpa [#allocation4], 0  ;;  %s1984_s0 = inlined_call_operand.vmem [shape: f32[16,32], index: 0, kind: input, shape index: {}]   ;;  %s1985_s1 = inlined_call_operand.vmem [shape: f32[16,96], index: 1, kind: input, shape index: {}]   ;;  %s1986_s2 = inlined_call_operand.vmem [shape: f32[32,32], index: 2, kind: input, shape index: {}]   ;;  %s1987_s3 = inlined_call_operand.vmem [shape: f32[1,32], index: 3, kind: input, shape index: {}]   ;;  %s1988_s4 = inlined_call_operand.vmem [shape: f32[32,96], index: 4, kind: input, shape index: {}]   ;;  %s1989_s5 = inlined_call_operand.vmem [shape: f32[1,96], index: 5, kind: input, shape index: {}]   ;;  %s1990_s6 = inlined_call_operand.hbm [shape: f32[384,256], index: 6, kind: input, shape index: {}]   ;;  %s1991_s7 = inlined_call_operand.vmem [shape: s32[1,384], index: 7, kind: input, shape index: {}]   ;;  %s1992_s8 = inlined_call_operand.vmem [shape: s32[384,1], index: 8, kind: input, shape index: {}]   ;;  %s1993_s9 = inlined_call_operand.hbm [shape: f32[16,128], index: 9, kind: output, shape index: {}]  }
   0x1   :  { %16 = vsyncpa [#allocation4 + $0x1], 0 }
   0x2   :  { %17 = vsyncpa [#allocation5], 0  ;;  %s1611_s30 = smov 0   ;;  %s1613_s10 = smov 0  }
   0x3   :  { %s1615_s11 = smov 0   ;;  %s1617_s12 = smov 0  }
   0x4 LB: > { %s1630_s13 = sadd.s32 4294967295, %s1547_s12   ;;  %s1633_s14 = sadd.s32 1, %s1547_s12   ;;  %s1547_s12 = sphi %s1617_s12, %s2002_s12   ;;  %s1543_s11 = sphi %s1615_s11, %s2001_s11   ;;  %s1539_s10 = sphi %s1613_s10, %s2000_s10   ;;  %s1535_s30 = sphi %s1611_s30, %s1999_s30  }
   0x5   : > { %s153_s15 = ssub.s32 %s1547_s12, %s1633_s14  ;;  %s156_s16 = sadd.s32 1, %s1543_s11 }
   0x6   : > { %p154_p0 = scmp.eq.s32.totalorder %s153_s15, 0  ;;  %p163_p1 = scmp.ne.s32.totalorder %s1543_s11, %s1539_s10 }
   0x7   : > { %p164_p2 = scmp.eq.s32.totalorder %s1547_s12, 0  ;;  %p169_p3 = scmp.ne.s32.totalorder %s1539_s10, %s1535_s30 }
   0x8   : > { %s1643_s17 = scalar_select %p154_p0, %s1543_s11, %s156_s16  }
   0x9   : > { %p165_p4 = por %p164_p2, %p163_p1  ;;  %p170_p5 = scmp.eq.s32.totalorder %s1630_s13, 0 }
   0xa   : > { %p1401_p6 = scmp.lt.s32.totalorder %s1547_s12, 3  ;;  %s284_s19 = sand.u32 1, %s1543_s11  }
   0xb   : > { %p1647_p7 = por %p170_p5, %p169_p3  ;;  %s1244_s20 = sshll.u32 %s284_s19, 8 }
   0xc   : > { %s1303_s21 = sshll.u32 %s1547_s12, 12  ;;  %s288_s25 = scalar_lea.vmem [#allocation3], %s1244_s20 }
   0xd   : > { %s1995_s18 = scalar_select %p1647_p7, 1, 0 }
   0xe   : > { %s1656_s24 = scalar_lea.hbm %s1990_s6, %s1303_s21  ;;  %s296_s26 = sshll.u32 %s288_s25, 4  ;;  %s1658_s26 = int_to_ptr.vmem [resolvable:$true] %s296_s26 }
   0xf   : > { %p1660_p8 = pnand %p1401_p6, %p165_p4  ;;  %s1665_s28 = scalar_lea.sflag [#allocation4], %s284_s19 }
  0x10   : > { %s1457_s29 = scalar_lea.hbm %s1656_s24, 4096  ;;  %s1462_s16 = scalar_lea.hbm %s1990_s6, 12288 }
  0x11   : > { %p1458_p10 = scmp.ne.s32.totalorder %s1656_s24, %s1457_s29  ;;  %p1459_p11 = pneg %p1660_p8 }
  0x12   : > { %p1463_p0 = scmp.lt.s32.totalorder %s1656_s24, %s1990_s6  ;;  %p1464_p1 = scmp.lt.s32.totalorder %s1462_s16, %s1457_s29 }
  0x13   : > { %p1460_p12 = pnand %p1459_p11, %p1458_p10 }
  0x14   : > { %p1465_p2 = por %p1464_p1, %p1463_p0 }
  0x15   : > { %p1461_p13 = pneg %p1460_p12 }
  0x17   : > { %p1466_p3 = pnand %p1465_p2, %p1461_p13 }
  0x19   : > { %1469 = shalt.err (!%p1466_p3)
}
  0x1a   : > { %s1470_s19 = scalar_lea.vmem %s1658_s26, 4096  ;;  %s1549_s22 = smov [#allocation3]  }
  0x1b   : > { %p1471_p4 = scmp.ne.s32.totalorder %s1658_s26, %s1470_s19  ;;  %s1475_s23 = sshll.u32 %s1549_s22, 4  ;;  %s1476_s23 = int_to_ptr.vmem [resolvable:$false] %s1475_s23 }
  0x1c   : > { %s1477_s25 = scalar_lea.vmem %s1476_s23, 8192  ;;  %p1478_p10 = scmp.lt.s32.totalorder %s1658_s26, %s1476_s23 }
  0x1d   : > { %p1473_p5 = pnand %p1471_p4, %p1459_p11  ;;  %p1479_p12 = scmp.lt.s32.totalorder %s1477_s25, %s1470_s19 }
  0x1f   : > { %p1474_p6 = pneg %p1473_p5  ;;  %p1480_p9 = por %p1479_p12, %p1478_p10 }
  0x21   : > { %p1481_p7 = pnand %p1480_p9, %p1474_p6 }
  0x23   : > { %1484 = shalt.err (!%p1481_p7)
}
  0x24   : > { %s1550_s29 = smov 256   ;;  %s1551_s30 = smov 16  }
  0x25   : > { %1400 = dma.hbm_to_vmem [thread:$0]  (!%p1660_p8), %s1656_s24, 4096, %s1658_s26, %s1665_s28, %s1550_s29, %s1550_s29, %s1551_s30  }
  0x26   : > { %p319_p11 = scmp.lt.s32.totalorder %s1547_s12, 4  ;;  %p1997_p13 = scmp.ge.s32.totalorder %s1547_s12, 1 }
  0x28   : > { %p320_p0 = pnand %p1997_p13, %p319_p11 }
  0x29   : > { %s325_s15 = sand.u32 (!%p320_p0), 1, %s1539_s10   ;;  %p1998_p7 = scmp.ne.s32.totalorder (!%p320_p0), %s1995_s18, 0 }
  0x2a   : > { %323 = sbr.rel (%p320_p0) target bundleno = 1244 (0x4dc), region = 56  ;;  %s1249_s16 = sshll.u32 (!%p320_p0), %s325_s15, 8 }
  0x2b   : > { %s326_s20 = scalar_lea.sflag (!%p320_p0), [#allocation4], %s325_s15  ;;  %s1690_s21 = scalar_lea.vmem (!%p320_p0), [#allocation3], %s1249_s16 }
  0x2f   : > { %1526 = dma.done.wait (%p1998_p7), %s326_s20, 4096  }
  0x30   : > { %1528 = vsyncadd (%p1998_p7), %s326_s20, 4294963200  ;;  %p368_p8 = scmp.lt.s32.totalorder %s1630_s13, 2  ;;  %s1250_s24 = sshll.u32 %s1630_s13, 4 }
  0x31   : > { %p372_p9 = scmp.lt.s32.totalorder %s1250_s24, 47  ;;  %p1252_p1 = scmp.ne.s32.totalorder %s1630_s13, 0 }
  0x32   : > { %s1699_s12 = scalar_select %p368_p8, %s1630_s13, 2 }
  0x33   : > { %s2004_s24 = smov (!%p372_p9, %s1250_s24), 47  ;;  %380 = sbr.rel (%p1252_p1) target bundleno = 622 (0x26e), region = 64 }
  0x34   : > { %s370_s28 = scalar_lea.vmem %s1991_s7, %s1699_s12  ;;  %s1251_s19 = sshll.u32 %s2004_s24, 3 }
  0x35   : > { %s1708_s18 = scalar_lea.vmem %s1992_s8, %s1251_s19  ;;  %s1552_s22 = smov (!%p1252_p1), 32  }
  0x36   : > { %s1553_s23 = smov (!%p1252_p1), 64   ;;  %s1554_s24 = smov (!%p1252_p1), 96  }
  0x38   : > { %v388_v0 = vld [vmem:[%s1986_s2 + $0x18] sm:$0xff]  ;;  %v387_v1 = vld [vmem:[%s1986_s2 + $0x10] sm:$0xff]  ;;  %vm396_vm0 = vcmask 261120   ;;  %v381_v2 = vld [vmem:[%s1984_s0] sm:$0xff]  ;;  %vm655_vm1 = vcmask 1047808   ;;  %vm586_vm2 = vcmask 523520  }
  0x39   : > { %1334 = vmatprep.subr.mxu0 %v388_v0  ;;  %v382_v3 = vld [vmem:[%s1984_s0 + $0x8] sm:$0xff]  ;;  %1342 = vmatprep.mubr.msk.f32.mxu0 %vm396_vm0, %v381_v2  ;;  %653 = vst.msk [vmem:[#allocation6] sm:$0xff] %vm396_vm0, %v381_v2  ;;  %v385_v5 = vld [vmem:[%s1986_s2] sm:$0xff]  ;;  %v495_v6 = vld [vmem:[%s1988_s4 + $0x18] sm:$0xff]  ;;  %vm597_vm3 = vcmask 785920   ;;  %vm606_vm4 = vcmask 1048320  }
  0x3a   : > { %1335 = vmatpush3.msra.mxu0 %v388_v0  ;;  %v386_v4 = vld [vmem:[%s1986_s2 + $0x8] sm:$0xff]  ;;  %654 = vst.msk [vmem:[#allocation6 + $0x8] sm:$0xff] %vm396_vm0, %v382_v3  ;;  %1345 = vmatprep.subr.mxu1 %v495_v6  ;;  %v494_v7 = vld [vmem:[%s1988_s4 + $0x10] sm:$0xff]  ;;  %v492_v9 = vld [vmem:[%s1988_s4] sm:$0xff] }
  0x3b   : > { %1336 = vmatprep.subr.mxu0 %v387_v1  ;;  %1346 = vmatpush3.msra.mxu1 %v495_v6  ;;  %v493_v8 = vld [vmem:[%s1988_s4 + $0x8] sm:$0xff]  ;;  %v383_v10 = vld [vmem:[%s1985_s1] sm:$0xff] }
  0x3c   : > { %1337 = vmatpush3.msra.mxu0 %v387_v1  ;;  %1347 = vmatprep.subr.mxu1 %v494_v7  ;;  %v384_v11 = vld [vmem:[%s1985_s1 + $0x8] sm:$0xff]  ;;  %v1253_v12 = vld [vmem:[%s1987_s3] ss:$0 sm:$0xff] }
  0x3d   : > { %1338 = vmatprep.subr.mxu0 %v386_v4  ;;  %1348 = vmatpush3.msra.mxu1 %v494_v7  ;;  %v1258_v29 = vld [vmem:[%s1989_s5] ss:$0 sm:$0xff] }
  0x3e   : > { %1339 = vmatpush3.msra.mxu0 %v386_v4  ;;  %1349 = vmatprep.subr.mxu1 %v493_v8 }
  0x3f   : > { %1340 = vmatprep.subr.mxu0 %v385_v5  ;;  %1350 = vmatpush3.msra.mxu1 %v493_v8 }
  0x40   : > { %1341 = vmatpush3.msra.mxu0 %v385_v5  ;;  %1351 = vmatprep.subr.mxu1 %v492_v9 }
  0x41   : > { %1343 = vmatmul.mubr.msk.f32.vlgmr.msra.gmra.mxu0 %vm396_vm0, %v382_v3  ;;  %1352 = vmatpush3.msra.mxu1 %v492_v9 }
  0x42   : > { %631 = vrot.lane.b32.xlu1 %v383_v10, %s1552_s22  ;;  %613 = vrot.lane.b32.xlu0 %v383_v10, %s1553_s23 }
  0x46   : > { %633 = vrot.lane.b32.xlu1 %v384_v11, %s1552_s22  ;;  %615 = vrot.lane.b32.xlu0 %v384_v11, %s1553_s23 }
  0xb4   : > { %v632_v23 = vpop.permute.xlu1 %631  ;;  %v614_v30 = vpop.permute.xlu0 %613 }
  0xb5   : > { %656 = vst.msk [vmem:[#allocation6] sm:$0xff] %vm655_vm1, %v632_v23 }
  0xb8   : > { %v634_v28 = vpop.permute.xlu1 %633  ;;  %v616_v35 = vpop.permute.xlu0 %615 }
  0xb9   : > { %657 = vst.msk [vmem:[#allocation6 + $0x8] sm:$0xff] %vm655_vm1, %v634_v28 }
 0x101   : > { %v1344_v13 = vpop.f32.mrf.mxu0 }
 0x102   : > { %v475_v14 = vadd.f32 %v1344_v13, %v1253_v12 }
 0x103   : > { %v469_v15 = vpop.f32.mrf.mxu0 }
 0x104   : > { %v1257_v16 = vmul.f32 -1.442695, %v475_v14  ;;  %v470_v17 = vadd.f32 %v1253_v12, %v469_v15 }
 0x106   : > { %1447 = vpow2.f32 %v1257_v16  ;;  %v1256_v18 = vmul.f32 -1.442695, %v470_v17 }
 0x108   : > { %1449 = vpow2.f32 %v1256_v18 }
 0x113   : > { %v1448_v19 = vpop.eup %1447 }
 0x114   : > { %v485_v20 = vadd.f32 1.0, %v1448_v19 }
 0x115   : > { %v1450_v21 = vpop.eup %1449 }
 0x116   : > { %v484_v22 = vadd.f32 1.0, %v1450_v21  ;;  %1451 = vrcp.f32 %v485_v20 }
 0x118   : > { %1453 = vrcp.f32 %v484_v22 }
 0x123   : > { %v1452_v24 = vpop.eup %1451 }
 0x124   : > { %v491_v27 = vmul.f32 %v1452_v24, %v475_v14 }
 0x125   : > { %v1454_v25 = vpop.eup %1453 }
 0x126   : > { %v490_v26 = vmul.f32 %v1454_v25, %v470_v17 }
 0x128   : > { %1353 = vmatprep.mubr.msk.f32.mxu1 %vm396_vm0, %v490_v26 }
 0x129   : > { %1354 = vmatmul.mubr.msk.f32.vlgmr.msra.gmra.mxu1 %vm396_vm0, %v491_v27 }
 0x1e9   : > { %v1355_v31 = vpop.f32.mrf.mxu1 }
 0x1ea   : > { %v581_v32 = vadd.f32 %v1355_v31, %v1258_v29 }
 0x1eb   : > { %v575_v33 = vpop.f32.mrf.mxu1 }
 0x1ec   : > { %585 = vst.msk [vmem:[#allocation2 + $0x10] sm:$0xff] %vm396_vm0, %v581_v32  ;;  %610 = vst.msk [vmem:[#allocation2 + $0x18] sm:$0xff] %vm396_vm0, %v581_v32  ;;  %v576_v34 = vadd.f32 %v1258_v29, %v575_v33  ;;  %593 = vrot.lane.b32.xlu1 %v581_v32, %s1552_s22  ;;  %v620_v36 = vmul.f32 %v616_v35, %v581_v32  ;;  %v642_v38 = vmul.f32 %v581_v32, %v384_v11 }
 0x1ed   : > { %588 = vst.msk [vmem:[#allocation2 + $0x10] sm:$0xff] %vm586_vm2, %v581_v32  ;;  %v638_v44 = vmul.f32 %v634_v28, %v581_v32 }
 0x1ee   : > { %584 = vst.msk [vmem:[#allocation2] sm:$0xff] %vm396_vm0, %v576_v34  ;;  %609 = vst.msk [vmem:[#allocation2 + $0x8] sm:$0xff] %vm396_vm0, %v576_v34  ;;  %591 = vrot.lane.b32.xlu0 %v576_v34, %s1552_s22  ;;  %v619_v37 = vmul.f32 %v614_v30, %v576_v34  ;;  %v641_v39 = vmul.f32 %v576_v34, %v383_v10  ;;  %v637_v47 = vmul.f32 %v632_v23, %v576_v34 }
 0x1ef   : > { %587 = vst.msk [vmem:[#allocation2] sm:$0xff] %vm586_vm2, %v576_v34 }
 0x1f0   : > { %602 = vrot.lane.b32.xlu1 %v581_v32, %s1553_s23 }
 0x1f2   : > { %600 = vrot.lane.b32.xlu0 %v576_v34, %s1553_s23 }
 0x1f4   : > { %625 = vrot.lane.b32.xlu1 %v620_v36, %s1554_s24 }
 0x1f6   : > { %623 = vrot.lane.b32.xlu0 %v619_v37, %s1554_s24 }
 0x1f8   : > { %647 = vrot.lane.b32.xlu1 %v642_v38, %s1552_s22 }
 0x1fa   : > { %645 = vrot.lane.b32.xlu0 %v641_v39, %s1552_s22 }
 0x25e   : > { %v594_v40 = vpop.permute.xlu1 %593 }
 0x25f   : > { %599 = vst.msk [vmem:[#allocation2 + $0x10] sm:$0xff] %vm597_vm3, %v594_v40 }
 0x260   : > { %v592_v41 = vpop.permute.xlu0 %591 }
 0x261   : > { %598 = vst.msk [vmem:[#allocation2] sm:$0xff] %vm597_vm3, %v592_v41 }
 0x262   : > { %v603_v42 = vpop.permute.xlu1 %602 }
 0x263   : > { %608 = vst.msk [vmem:[#allocation2 + $0x10] sm:$0xff] %vm606_vm4, %v603_v42 }
 0x264   : > { %v601_v43 = vpop.permute.xlu0 %600 }
 0x265   : > { %607 = vst.msk [vmem:[#allocation2] sm:$0xff] %vm606_vm4, %v601_v43 }
 0x266   : > { %v626_v45 = vpop.permute.xlu1 %625 }
 0x267   : > { %630 = vst.msk [vmem:[#allocation2 + $0x18] sm:$0xff] %vm586_vm2, %v626_v45 }
 0x268   : > { %640 = vst.msk [vmem:[#allocation2 + $0x18] sm:$0xff] %vm597_vm3, %v638_v44  ;;  %v624_v46 = vpop.permute.xlu0 %623 }
 0x269   : > { %629 = vst.msk [vmem:[#allocation2 + $0x8] sm:$0xff] %vm586_vm2, %v624_v46 }
 0x26a   : > { %v648_v48 = vpop.permute.xlu1 %647  ;;  %639 = vst.msk [vmem:[#allocation2 + $0x8] sm:$0xff] %vm597_vm3, %v637_v47 }
 0x26b   : > { %652 = vst.msk [vmem:[#allocation2 + $0x18] sm:$0xff] %vm606_vm4, %v648_v48 }
 0x26c   : > { %v646_v49 = vpop.permute.xlu0 %645 }
 0x26d   : > { %651 = vst.msk [vmem:[#allocation2 + $0x8] sm:$0xff] %vm606_vm4, %v646_v49 }
 0x26e PF: > { %v692_v50 = vld [vmem:[%s1708_s18 + $0x10] sm:$0xff]  ;;  %v690_v51 = vld [vmem:[%s1708_s18] sm:$0xff]  ;;  %v1555_v52 = vmov 0   ;;  %v693_v53 = vld [vmem:[%s1708_s18 + $0x18] sm:$0xff]  ;;  %v1556_v55 = vmov 0.0   ;;  %v707_v8 = vlaneseq  ;;  %vm809_vm5 = vcmask 130048  }
 0x26f   : > { %1456 = vset.pattern.permute.xlu1 %v1555_v52  ;;  %1455 = vset.pattern.permute.xlu0 %v1555_v52  ;;  %v691_v54 = vld [vmem:[%s1708_s18 + $0x8] sm:$0xff]  ;;  %v807_v57 = vld [vmem:[#allocation2 + $0x10] sm:$0xff]  ;;  %v694_v60 = vld [vmem:[%s1708_s18 + $0x20] sm:$0xff]  ;;  %v1557_v45 = vmov 1.0   ;;  %p1402_p2 = scmp.eq.s32.totalorder %s1630_s13, 2 }
 0x270   : > { %716 = vperm.xlu1 %1456, %v692_v50   ;;  %710 = vperm.xlu0 %1455, %v690_v51   ;;  %v695_v59 = vld [vmem:[%s1708_s18 + $0x28] sm:$0xff]  ;;  %v805_v61 = vld [vmem:[#allocation2] sm:$0xff]  ;;  %v697_v62 = vld [vmem:[%s1708_s18 + $0x38] sm:$0xff]  ;;  %v1803_v9 = vand.u32 127, %v707_v8  ;;  %v1068_v42 = vshrl.u32 %v707_v8, 7 }
 0x271   : > { %922 = vmatprep.mubr.f32.mxu0 %v1556_v55  ;;  %v696_v63 = vld [vmem:[%s1708_s18 + $0x30] sm:$0xff]  ;;  %v699_v0 = vld [vmem:[%s1708_s18 + $0x48] sm:$0xff]  ;;  %v698_v1 = vld [vmem:[%s1708_s18 + $0x40] sm:$0xff] }
 0x272   : > { %v808_v56 = vld [vmem:[#allocation2 + $0x18] sm:$0xff]  ;;  %v700_v3 = vld [vmem:[%s1708_s18 + $0x50] sm:$0xff]  ;;  %v703_v4 = vld [vmem:[%s1708_s18 + $0x68] sm:$0xff]  ;;  %v1876_v44 = vadd.s32 8, %v1068_v42 }
 0x273   : > { %886 = vmatprep.subr.mxu0 %v808_v56  ;;  %v701_v2 = vld [vmem:[%s1708_s18 + $0x58] sm:$0xff]  ;;  %v702_v5 = vld [vmem:[%s1708_s18 + $0x60] sm:$0xff]  ;;  %v704_v7 = vld [vmem:[%s1708_s18 + $0x70] sm:$0xff] }
 0x274   : > { %719 = vperm.xlu1 %1456, %v693_v53   ;;  %713 = vperm.xlu0 %1455, %v691_v54   ;;  %v806_v58 = vld [vmem:[#allocation2 + $0x8] sm:$0xff]  ;;  %v705_v6 = vld [vmem:[%s1708_s18 + $0x78] sm:$0xff]  ;;  %v1874_v43 = vld [vmem:[%s370_s28] ss:$0 sm:$0xff] }
 0x275   : > { %887 = vmatpush1.msra.mxu0 %v807_v57  ;;  %v658_v46 = vld [vmem:[%s1690_s21] sm:$0xff]  ;;  %v659_v48 = vld [vmem:[%s1690_s21 + $0x8] sm:$0xff]  ;;  %v660_v52 = vld [vmem:[%s1690_s21 + $0x10] sm:$0xff] }
 0x276   : > { %888 = vmatprep.subr.mxu0 %v806_v58  ;;  %v661_v54 = vld [vmem:[%s1690_s21 + $0x18] sm:$0xff] }
 0x277   : > { %889 = vmatpush1.msra.mxu0 %v805_v61  ;;  %v663_v61 = vld [vmem:[%s1690_s21 + $0x28] sm:$0xff] }
 0x278   : > { %725 = vperm.xlu1 %1456, %v695_v59   ;;  %722 = vperm.xlu0 %1455, %v694_v60   ;;  %v662_v59 = vld [vmem:[%s1690_s21 + $0x20] sm:$0xff] }
 0x27c   : > { %731 = vperm.xlu1 %1456, %v697_v62   ;;  %728 = vperm.xlu0 %1455, %v696_v63  }
 0x280   : > { %737 = vperm.xlu1 %1456, %v699_v0   ;;  %734 = vperm.xlu0 %1455, %v698_v1  }
 0x284   : > { %743 = vperm.xlu1 %1456, %v701_v2   ;;  %740 = vperm.xlu0 %1455, %v700_v3   ;;  %v664_v2 = vld [vmem:[%s1690_s21 + $0x30] sm:$0xff] }
 0x288   : > { %749 = vperm.xlu1 %1456, %v703_v4   ;;  %746 = vperm.xlu0 %1455, %v702_v5   ;;  %v665_v4 = vld [vmem:[%s1690_s21 + $0x38] sm:$0xff] }
 0x28c   : > { %755 = vperm.xlu1 %1456, %v705_v6   ;;  %752 = vperm.xlu0 %1455, %v704_v7  }
 0x2eb   : > { %v711_v10 = vpop.permute.xlu0 %710  ;;  %v717_v12 = vpop.permute.xlu1 %716 }
 0x2ec   : > { %vm757_vm6 = vcmp.eq.s32.totalorder %v711_v10, %v1803_v9  ;;  %vm759_vm7 = vcmp.eq.s32.totalorder %v717_v12, %v1803_v9 }
 0x2ed   : > { %v1261_v11 = vsel %vm757_vm6, 1.0, %v1556_v55  ;;  %v1263_v15 = vsel %vm759_vm7, 1.0, %v1556_v55  ;;  %vm1074_vm7 = vcmp.eq.s32.totalorder %v1068_v42, %v1874_v43  ;;  %v686_v42 = vld [vmem:[%s1690_s21 + $0xe0] sm:$0xff] }
 0x2ee   : > { %1277 = vmatmul.mubr.msk.f32.vlgmr.msra.gmra.mxu0 %vm809_vm5, %v1261_v11  ;;  %1388 = vmatprep.mubr.msk.f32.mxu1 %vm1074_vm7, %v1557_v45  ;;  %v667_v11 = vld [vmem:[%s1690_s21 + $0x48] sm:$0xff] }
 0x2ef   : > { %v714_v13 = vpop.permute.xlu0 %713  ;;  %928 = vmatprep.mubr.f32.mxu0 %v1556_v55  ;;  %v720_v16 = vpop.permute.xlu1 %719 }
 0x2f0   : > { %vm758_vm8 = vcmp.eq.s32.totalorder %v714_v13, %v1803_v9  ;;  %vm760_vm9 = vcmp.eq.s32.totalorder %v720_v16, %v1803_v9 }
 0x2f1   : > { %v1262_v14 = vsel %vm758_vm8, 1.0, %v1556_v55  ;;  %v1264_v18 = vsel %vm760_vm9, 1.0, %v1556_v55  ;;  %vm1075_vm8 = vcmp.eq.s32.totalorder %v1876_v44, %v1874_v43 }
 0x2f2   : > { %1278 = vmatmul.mubr.msk.f32.gmra.mxu0 %vm809_vm5, %v1262_v14 }
 0x2f3   : > { %934 = vmatprep.mubr.f32.mxu0 %v1556_v55  ;;  %v723_v17 = vpop.permute.xlu0 %722  ;;  %v726_v19 = vpop.permute.xlu1 %725 }
 0x2f4   : > { %vm761_vm10 = vcmp.eq.s32.totalorder %v723_v17, %v1803_v9  ;;  %vm762_vm11 = vcmp.eq.s32.totalorder %v726_v19, %v1803_v9 }
 0x2f5   : > { %v1265_v20 = vsel %vm761_vm10, 1.0, %v1556_v55  ;;  %v1266_v22 = vsel %vm762_vm11, 1.0, %v1556_v55 }
 0x2f6   : > { %1279 = vmatmul.mubr.msk.f32.gmra.mxu0 %vm809_vm5, %v1263_v15 }
 0x2f7   : > { %940 = vmatprep.mubr.f32.mxu0 %v1556_v55  ;;  %v729_v21 = vpop.permute.xlu0 %728  ;;  %v732_v23 = vpop.permute.xlu1 %731 }
 0x2f8   : > { %vm763_vm12 = vcmp.eq.s32.totalorder %v729_v21, %v1803_v9  ;;  %vm764_vm13 = vcmp.eq.s32.totalorder %v732_v23, %v1803_v9 }
 0x2f9   : > { %v1267_v24 = vsel %vm763_vm12, 1.0, %v1556_v55  ;;  %v1268_v26 = vsel %vm764_vm13, 1.0, %v1556_v55 }
 0x2fa   : > { %1280 = vmatmul.mubr.msk.f32.gmra.mxu0 %vm809_vm5, %v1264_v18 }
 0x2fb   : > { %946 = vmatprep.mubr.f32.mxu0 %v1556_v55  ;;  %v735_v25 = vpop.permute.xlu0 %734  ;;  %v738_v27 = vpop.permute.xlu1 %737 }
 0x2fc   : > { %vm765_vm14 = vcmp.eq.s32.totalorder %v735_v25, %v1803_v9  ;;  %vm766_vm15 = vcmp.eq.s32.totalorder %v738_v27, %v1803_v9 }
 0x2fd   : > { %v1269_v28 = vsel %vm765_vm14, 1.0, %v1556_v55  ;;  %v1270_v30 = vsel %vm766_vm15, 1.0, %v1556_v55 }
 0x2fe   : > { %1281 = vmatmul.mubr.msk.f32.gmra.mxu0 %vm809_vm5, %v1265_v20 }
 0x2ff   : > { %952 = vmatprep.mubr.f32.mxu0 %v1556_v55  ;;  %v741_v29 = vpop.permute.xlu0 %740  ;;  %v744_v31 = vpop.permute.xlu1 %743 }
 0x300   : > { %vm767_vm0 = vcmp.eq.s32.totalorder %v741_v29, %v1803_v9  ;;  %vm768_vm1 = vcmp.eq.s32.totalorder %v744_v31, %v1803_v9 }
 0x301   : > { %v1271_v32 = vsel %vm767_vm0, 1.0, %v1556_v55  ;;  %v1272_v34 = vsel %vm768_vm1, 1.0, %v1556_v55 }
 0x302   : > { %1282 = vmatmul.mubr.msk.f32.gmra.mxu0 %vm809_vm5, %v1266_v22 }
 0x303   : > { %958 = vmatprep.mubr.f32.mxu0 %v1556_v55  ;;  %v747_v33 = vpop.permute.xlu0 %746  ;;  %v750_v35 = vpop.permute.xlu1 %749 }
 0x304   : > { %vm769_vm2 = vcmp.eq.s32.totalorder %v747_v33, %v1803_v9  ;;  %vm770_vm3 = vcmp.eq.s32.totalorder %v750_v35, %v1803_v9 }
 0x305   : > { %v1273_v36 = vsel %vm769_vm2, 1.0, %v1556_v55  ;;  %v1274_v38 = vsel %vm770_vm3, 1.0, %v1556_v55 }
 0x306   : > { %1283 = vmatmul.mubr.msk.f32.gmra.mxu0 %vm809_vm5, %v1267_v24 }
 0x307   : > { %964 = vmatprep.mubr.f32.mxu0 %v1556_v55  ;;  %v753_v37 = vpop.permute.xlu0 %752  ;;  %v756_v39 = vpop.permute.xlu1 %755 }
 0x308   : > { %vm771_vm4 = vcmp.eq.s32.totalorder %v753_v37, %v1803_v9  ;;  %vm772_vm6 = vcmp.eq.s32.totalorder %v756_v39, %v1803_v9  ;;  %v666_v9 = vld [vmem:[%s1690_s21 + $0x40] sm:$0xff]  ;;  %v687_v37 = vld [vmem:[%s1690_s21 + $0xe8] sm:$0xff] }
 0x309   : > { %v1275_v40 = vsel %vm771_vm4, 1.0, %v1556_v55  ;;  %v1276_v41 = vsel %vm772_vm6, 1.0, %v1556_v55 }
 0x30a   : > { %1284 = vmatmul.mubr.msk.f32.gmra.mxu0 %vm809_vm5, %v1268_v26 }
 0x30b   : > { %970 = vmatprep.mubr.f32.mxu0 %v1556_v55 }
 0x30e   : > { %1285 = vmatmul.mubr.msk.f32.gmra.mxu0 %vm809_vm5, %v1269_v28 }
 0x30f   : > { %976 = vmatprep.mubr.f32.mxu0 %v1556_v55 }
 0x312   : > { %1286 = vmatmul.mubr.msk.f32.gmra.mxu0 %vm809_vm5, %v1270_v30 }
 0x313   : > { %982 = vmatprep.mubr.f32.mxu0 %v1556_v55 }
 0x316   : > { %1287 = vmatmul.mubr.msk.f32.gmra.mxu0 %vm809_vm5, %v1271_v32 }
 0x317   : > { %988 = vmatprep.mubr.f32.mxu0 %v1556_v55 }
 0x31a   : > { %1288 = vmatmul.mubr.msk.f32.gmra.mxu0 %vm809_vm5, %v1272_v34 }
 0x31b   : > { %994 = vmatprep.mubr.f32.mxu0 %v1556_v55 }
 0x31e   : > { %1289 = vmatmul.mubr.msk.f32.gmra.mxu0 %vm809_vm5, %v1273_v36 }
 0x31f   : > { %1000 = vmatprep.mubr.f32.mxu0 %v1556_v55 }
 0x322   : > { %1290 = vmatmul.mubr.msk.f32.gmra.mxu0 %vm809_vm5, %v1274_v38  ;;  %v688_v38 = vld [vmem:[%s1690_s21 + $0xf0] sm:$0xff] }
 0x323   : > { %1006 = vmatprep.mubr.f32.mxu0 %v1556_v55 }
 0x326   : > { %1291 = vmatmul.mubr.msk.f32.gmra.mxu0 %vm809_vm5, %v1275_v40  ;;  %v689_v40 = vld [vmem:[%s1690_s21 + $0xf8] sm:$0xff] }
 0x327   : > { %1012 = vmatprep.mubr.f32.mxu0 %v1556_v55 }
 0x32a   : > { %1292 = vmatmul.mubr.msk.f32.gmra.mxu0 %vm809_vm5, %v1276_v41  ;;  %v685_v41 = vld [vmem:[%s1690_s21 + $0xd8] sm:$0xff] }
 0x3ae   : > { %v924_v47 = vpop.f32.mrf.mxu0 }
 0x3af   : > { %v1019_v50 = vmul.f32 %v924_v47, %v658_v46 }
 0x3b0   : > { %v926_v49 = vpop.f32.mrf.mxu0 }
 0x3b1   : > { %v1020_v51 = vmul.f32 %v926_v49, %v659_v48 }
 0x3b2   : > { %v930_v53 = vpop.f32.mrf.mxu0 }
 0x3b3   : > { %v1886_v55 = vadd.f32 %v1020_v51, %v1019_v50  ;;  %v1021_v57 = vmul.f32 %v930_v53, %v660_v52  ;;  %v683_v50 = vld [vmem:[%s1690_s21 + $0xc8] sm:$0xff]  ;;  %v684_v51 = vld [vmem:[%s1690_s21 + $0xd0] sm:$0xff] }
 0x3b4   : > { %v932_v56 = vpop.f32.mrf.mxu0 }
 0x3b5   : > { %v1022_v58 = vmul.f32 %v932_v56, %v661_v54  ;;  %v681_v56 = vld [vmem:[%s1690_s21 + $0xb8] sm:$0xff] }
 0x3b6   : > { %v936_v60 = vpop.f32.mrf.mxu0 }
 0x3b7   : > { %v1890_v62 = vadd.f32 %v1022_v58, %v1021_v57  ;;  %v1023_v0 = vmul.f32 %v936_v60, %v662_v59  ;;  %v682_v57 = vld [vmem:[%s1690_s21 + $0xc0] sm:$0xff] }
 0x3b8   : > { %v938_v63 = vpop.f32.mrf.mxu0 }
 0x3b9   : > { %v1024_v1 = vmul.f32 %v938_v63, %v663_v61  ;;  %v679_v61 = vld [vmem:[%s1690_s21 + $0xa8] sm:$0xff]  ;;  %v680_v63 = vld [vmem:[%s1690_s21 + $0xb0] sm:$0xff] }
 0x3ba   : > { %v942_v3 = vpop.f32.mrf.mxu0 }
 0x3bb   : > { %v1894_v5 = vadd.f32 %v1024_v1, %v1023_v0  ;;  %v1025_v7 = vmul.f32 %v942_v3, %v664_v2  ;;  %v677_v3 = vld [vmem:[%s1690_s21 + $0x98] sm:$0xff] }
 0x3bc   : > { %v944_v6 = vpop.f32.mrf.mxu0 }
 0x3bd   : > { %v1026_v8 = vmul.f32 %v944_v6, %v665_v4  ;;  %v678_v4 = vld [vmem:[%s1690_s21 + $0xa0] sm:$0xff] }
 0x3be   : > { %v948_v10 = vpop.f32.mrf.mxu0 }
 0x3bf   : > { %v1898_v12 = vadd.f32 %v1026_v8, %v1025_v7  ;;  %v1027_v14 = vmul.f32 %v948_v10, %v666_v9  ;;  %v675_v9 = vld [vmem:[%s1690_s21 + $0x88] sm:$0xff]  ;;  %v676_v10 = vld [vmem:[%s1690_s21 + $0x90] sm:$0xff] }
 0x3c0   : > { %v950_v13 = vpop.f32.mrf.mxu0 }
 0x3c1   : > { %v1028_v15 = vmul.f32 %v950_v13, %v667_v11 }
 0x3c2   : > { %v1900_v16 = vpop.f32.mrf.mxu0 }
 0x3c3   : > { %v1902_v17 = vadd.f32 %v1028_v15, %v1027_v14  ;;  %v673_v15 = vld [vmem:[%s1690_s21 + $0x78] sm:$0xff] }
 0x3c4   : > { %v1904_v18 = vpop.f32.mrf.mxu0 }
 0x3c6   : > { %v1906_v19 = vpop.f32.mrf.mxu0 }
 0x3c8   : > { %v1908_v20 = vpop.f32.mrf.mxu0 }
 0x3ca   : > { %v1910_v21 = vpop.f32.mrf.mxu0 }
 0x3cc   : > { %v1912_v22 = vpop.f32.mrf.mxu0 }
 0x3ce   : > { %v1914_v23 = vpop.f32.mrf.mxu0 }
 0x3d0   : > { %v974_v24 = vpop.f32.mrf.mxu0 }
 0x3d2   : > { %v978_v25 = vpop.f32.mrf.mxu0 }
 0x3d4   : > { %v980_v26 = vpop.f32.mrf.mxu0 }
 0x3d5   : > { %v1038_v11 = vmul.f32 %v980_v26, %v677_v3 }
 0x3d6   : > { %v984_v27 = vpop.f32.mrf.mxu0 }
 0x3d7   : > { %v1039_v13 = vmul.f32 %v984_v27, %v678_v4 }
 0x3d8   : > { %v986_v28 = vpop.f32.mrf.mxu0 }
 0x3d9   : > { %v1040_v6 = vmul.f32 %v986_v28, %v679_v61 }
 0x3da   : > { %v990_v29 = vpop.f32.mrf.mxu0 }
 0x3db   : > { %v1041_v7 = vmul.f32 %v990_v29, %v680_v63  ;;  %v1061_v28 = vadd.f32 %v1040_v6, %v1039_v13  ;;  %v671_v29 = vld [vmem:[%s1690_s21 + $0x68] sm:$0xff] }
 0x3dc   : > { %v992_v30 = vpop.f32.mrf.mxu0 }
 0x3dd   : > { %v1042_v0 = vmul.f32 %v992_v30, %v681_v56  ;;  %v674_v30 = vld [vmem:[%s1690_s21 + $0x80] sm:$0xff] }
 0x3de   : > { %v996_v31 = vpop.f32.mrf.mxu0  ;;  %v1035_v26 = vmul.f32 %v1914_v23, %v674_v30 }
 0x3df   : > { %v1043_v1 = vmul.f32 %v996_v31, %v682_v57  ;;  %v1062_v14 = vadd.f32 %v1042_v0, %v1041_v7  ;;  %v1036_v31 = vmul.f32 %v974_v24, %v675_v9 }
 0x3e0   : > { %v998_v32 = vpop.f32.mrf.mxu0 }
 0x3e1   : > { %v1044_v58 = vmul.f32 %v998_v32, %v683_v50  ;;  %v1037_v32 = vmul.f32 %v978_v25, %v676_v10  ;;  %v1059_v25 = vadd.f32 %v1036_v31, %v1035_v26 }
 0x3e2   : > { %v1002_v33 = vpop.f32.mrf.mxu0 }
 0x3e3   : > { %v1045_v59 = vmul.f32 %v1002_v33, %v684_v51  ;;  %v1063_v8 = vadd.f32 %v1044_v58, %v1043_v1  ;;  %v672_v33 = vld [vmem:[%s1690_s21 + $0x70] sm:$0xff]  ;;  %v1060_v27 = vadd.f32 %v1038_v11, %v1037_v32 }
 0x3e4   : > { %v1004_v34 = vpop.f32.mrf.mxu0  ;;  %v1033_v24 = vmul.f32 %v1910_v21, %v672_v33 }
 0x3e5   : > { %v1046_v52 = vmul.f32 %v1004_v34, %v685_v41  ;;  %v1034_v34 = vmul.f32 %v1912_v22, %v673_v15 }
 0x3e6   : > { %v1008_v35 = vpop.f32.mrf.mxu0 }
 0x3e7   : > { %v1047_v53 = vmul.f32 %v1008_v35, %v686_v42  ;;  %v1064_v2 = vadd.f32 %v1046_v52, %v1045_v59  ;;  %v669_v35 = vld [vmem:[%s1690_s21 + $0x58] sm:$0xff]  ;;  %v1058_v22 = vadd.f32 %v1034_v34, %v1033_v24 }
 0x3e8   : > { %v1010_v36 = vpop.f32.mrf.mxu0 }
 0x3e9   : > { %v1048_v47 = vmul.f32 %v1010_v36, %v687_v37  ;;  %v670_v36 = vld [vmem:[%s1690_s21 + $0x60] sm:$0xff]  ;;  %v1032_v37 = vmul.f32 %v1908_v20, %v671_v29 }
 0x3ea   : > { %v1014_v39 = vpop.f32.mrf.mxu0 }
 0x3eb   : > { %v1049_v48 = vmul.f32 %v1014_v39, %v688_v38  ;;  %v1065_v60 = vadd.f32 %v1048_v47, %v1047_v53  ;;  %v668_v38 = vld [vmem:[%s1690_s21 + $0x50] sm:$0xff]  ;;  %v1030_v39 = vmul.f32 %v1904_v18, %v669_v35  ;;  %s1558_s21 = smov [#allocation6]  }
 0x3ec   : > { %v1016_v46 = vpop.f32.mrf.mxu0  ;;  %v1029_v23 = vmul.f32 %v1900_v16, %v668_v38  ;;  %v1081_v16 = vld [vmem:[#allocation6 + $0x8] sm:$0xff]  ;;  %s1167_s12 = sshll.u32 %s1558_s21, 4  ;;  %s1168_s12 = int_to_ptr.vmem [resolvable:$true] %s1167_s12 }
 0x3ed   : > { %v1050_v49 = vmul.f32 %v1016_v46, %v689_v40  ;;  %v1031_v40 = vmul.f32 %v1906_v19, %v670_v36  ;;  %s1485_s28 = scalar_lea.vmem %s1168_s12, 256  ;;  %p1492_p6 = scmp.lt.s32.totalorder %s1168_s12, %s1168_s12 }
 0x3ee   : > { %v1056_v42 = vadd.f32 %v1030_v39, %v1029_v23  ;;  %p1486_p3 = scmp.ne.s32.totalorder %s1168_s12, %s1485_s28  ;;  %p1493_p10 = scmp.lt.s32.totalorder %s1485_s28, %s1485_s28 }
 0x3ef   : > { %v1066_v54 = vadd.f32 %v1050_v49, %v1049_v48  ;;  %v1057_v41 = vadd.f32 %v1032_v37, %v1031_v40 }
 0x3f0   : > { %p1487_p4 = pnand %p1486_p3, %p1402_p2  ;;  %p1494_p12 = por %p1493_p10, %p1492_p6 }
 0x3f1   : > { %1356 = vmatprep.subr.mxu1 %v1066_v54 }
 0x3f2   : > { %1357 = vmatpush3.msra.mxu1 %v1066_v54  ;;  %p1488_p5 = pneg %p1487_p4 }
 0x3f3   : > { %1358 = vmatprep.subr.mxu1 %v1065_v60 }
 0x3f4   : > { %1359 = vmatpush3.msra.mxu1 %v1065_v60  ;;  %p1495_p11 = pnand %p1494_p12, %p1488_p5 }
 0x3f5   : > { %1360 = vmatprep.subr.mxu1 %v1064_v2 }
 0x3f6   : > { %1361 = vmatpush3.msra.mxu1 %v1064_v2 }
 0x3f7   : > { %1362 = vmatprep.subr.mxu1 %v1063_v8 }
 0x3f8   : > { %1363 = vmatpush3.msra.mxu1 %v1063_v8 }
 0x3f9   : > { %1364 = vmatprep.subr.mxu1 %v1062_v14 }
 0x3fa   : > { %1365 = vmatpush3.msra.mxu1 %v1062_v14 }
 0x3fb   : > { %1366 = vmatprep.subr.mxu1 %v1061_v28 }
 0x3fc   : > { %1367 = vmatpush3.msra.mxu1 %v1061_v28 }
 0x3fd   : > { %1368 = vmatprep.subr.mxu1 %v1060_v27 }
 0x3fe   : > { %1369 = vmatpush3.msra.mxu1 %v1060_v27 }
 0x3ff   : > { %1370 = vmatprep.subr.mxu1 %v1059_v25 }
 0x400   : > { %1371 = vmatpush3.msra.mxu1 %v1059_v25 }
 0x401   : > { %1372 = vmatprep.subr.mxu1 %v1058_v22 }
 0x402   : > { %1373 = vmatpush3.msra.mxu1 %v1058_v22 }
 0x403   : > { %1374 = vmatprep.subr.mxu1 %v1057_v41 }
 0x404   : > { %1375 = vmatpush3.msra.mxu1 %v1057_v41 }
 0x405   : > { %1376 = vmatprep.subr.mxu1 %v1056_v42 }
 0x406   : > { %1377 = vmatpush3.msra.mxu1 %v1056_v42 }
 0x407   : > { %1378 = vmatprep.subr.mxu1 %v1902_v17 }
 0x408   : > { %1379 = vmatpush3.msra.mxu1 %v1902_v17  ;;  %v1080_v17 = vld [vmem:[#allocation6] sm:$0xff] }
 0x409   : > { %1380 = vmatprep.subr.mxu1 %v1898_v12 }
 0x40a   : > { %1381 = vmatpush3.msra.mxu1 %v1898_v12 }
 0x40b   : > { %1382 = vmatprep.subr.mxu1 %v1894_v5 }
 0x40c   : > { %1383 = vmatpush3.msra.mxu1 %v1894_v5 }
 0x40d   : > { %1384 = vmatprep.subr.mxu1 %v1890_v62 }
 0x40e   : > { %1385 = vmatpush3.msra.mxu1 %v1890_v62 }
 0x40f   : > { %1386 = vmatprep.subr.mxu1 %v1886_v55 }
 0x410   : > { %1387 = vmatpush3.msra.mxu1 %v1886_v55 }
 0x411   : > { %1389 = vmatmul.mubr.msk.f32.vlgmr.msra.gmra.mxu1 %vm1075_vm8, %v1557_v45 }
 0x4d1   : > { %v1390_v12 = vpop.f32.mrf.mxu1 }
 0x4d2   : > { %v1158_v5 = vadd.f32 %v1390_v12, %v1081_v16 }
 0x4d3   : > { %v1148_v18 = vpop.f32.mrf.mxu1 }
 0x4d4   : > { %1160 = vst [vmem:[#allocation6 + $0x8] sm:$0xff] %v1158_v5  ;;  %v1157_v62 = vadd.f32 %v1148_v18, %v1080_v17 }
 0x4d6   : > { %1159 = vst [vmem:[#allocation6] sm:$0xff] %v1157_v62 }
 0x4d7   : > { %1498 = shalt.err (!%p1495_p11)
}
 0x4d8   : > { %s1559_s27 = smov 128   ;;  %s1560_s19 = smov 8  }
 0x4d9   : > { %1394 = dma.vmem_to_hbm [thread:$0]  (%p1402_p2), %s1168_s12, 256, %s1993_s9, [#allocation5], %s1559_s27, %s1559_s27, %s1560_s19  }
 0x4da   : > { %1530 = dma.done.wait (%p1402_p2), [#allocation5], 256  }
 0x4db   : > { %1532 = vsyncadd (%p1402_p2), [#allocation5], 4294967040 }
 0x4dc PF: > { %p20_p13 = scmp.ge.s32.totalorder %s1633_s14, 5   ;;  %s1999_s30 = smov %s1539_s10 }
 0x4dd   : > { %s2000_s10 = smov %s1543_s11  ;;  %s2001_s11 = smov %s1643_s17 }
 0x4de   : > { %s2002_s12 = smov %s1633_s14  ;;  %22 = sbr.rel (!%p20_p13) target bundleno = 4 (0x4), region = 103 }
 0x4e3   :  { %1183 = vsyncpa [#allocation4], 1 }
 0x4e4   :  { %1185 = vsyncpa [#allocation4 + $0x1], 1 }
 0x4e5   :  { %1186 = vsyncpa [#allocation5], 1 }
 0x4e6   :  { %1188 = vsyncpa [#allocation5 + $0x1], 1 }

</bundles_post_ra>
